<compile_context>
chip_gen: v6e
topology: v6e:2x2x1
jax: 0.10.0
libtpu: 0.0.40
codegen_flags: <defaults>
</compile_context>

<pallas_src>
import functools

import jax
import jax.numpy as jnp
from jax import lax
from jax.experimental import pallas as pl
from jax.experimental.pallas import tpu as pltpu


MIDDLE = 30            # hard-coded in the PyTorch module
MID_PAD = 32           # middle channels + ones-channel (30 real, 1 ones, 1 zero pad)
LANE = 128             # TPU lane width
CHUNK = 256            # compute sub-chunk (2 interleaved per fori_loop iteration)
TS_TARGET = 16384      # target lane tile (per grid step) along flattened H*W
MIN_STEPS = 8          # keep >= 8 grid steps when possible (v7x has 2 TensorCores)
VMEM_BUDGET = 8 << 20  # conservative per-step VMEM budget (double-buffered in+out)


def _choose_tiles(hw_pad, ts_target, chunk_target):
    """hw_pad is a multiple of LANE.  Returns (lane_tile, compute_chunk)."""
    chunk = chunk_target if hw_pad % chunk_target == 0 else LANE
    chunk = min(chunk, hw_pad)
    m = hw_pad // chunk
    kmax = max(1, min(m, ts_target // chunk))
    ts = chunk
    for k in range(kmax, 0, -1):          # largest multiple of chunk dividing hw_pad
        if m % k == 0:
            ts = k * chunk
            break
    if ts < 2048 and ts != hw_pad:
        # No decent divisor: take a big tile and accept one partial last lane tile
        # (dead chunks there are skipped inside the kernel with pl.when).
        ts = kmax * chunk
    return ts, chunk


def _refinement_kernel(x_ref, wb_ref, bb_ref, wblk_ref, we_ref, o_ref, *,
                       block_num, chunk, hw_total, maybe_partial,
                       matmul_dtype, chain_dtype):
    # x_ref:    (B_blk, Cin, TS)                    f32
    # wb_ref:   (MID_PAD, Cin)                      matmul_dtype
    # bb_ref:   (MID_PAD, 1)                        f32   (begin bias + ones channel)
    # wblk_ref: (block_num, 2, MID_PAD, MID_PAD)    matmul_dtype (biases folded in)
    # we_ref:   (Cout, MID_PAD)                     matmul_dtype (bias folded in)
    # o_ref:    (B_blk, Cout, TS)                   f32
    b_blk = x_ref.shape[0]
    ts = x_ref.shape[-1]
    nchunks = ts // chunk                 # exact by construction
    npairs = nchunks // 2

    wb = wb_ref[...]
    wblk = wblk_ref[...]
    we = we_ref[...]
    # Hoisted once per grid step (JAX does not CSE broadcast_in_dim): the only
    # remaining bias broadcast in the whole kernel.
    bb_bc = jnp.broadcast_to(bb_ref[...], (MID_PAD, chunk))

    if maybe_partial:
        # number of valid lanes of this tile (tile may overhang the array end)
        valid = hw_total - pl.program_id(1) * ts
    else:
        valid = None

    def compute(x_chunk):
        # begin: 1x1 conv (no activation); row MIDDLE of h is the constant 1.
        h = jnp.dot(wb, x_chunk.astype(matmul_dtype),
                    preferred_element_type=jnp.float32) + bb_bc
        h = h.astype(chain_dtype)
        # middle: block_num spectral residual blocks, biases folded into weights.
        # NOTE: block_num is small; for deep stacks switch this static loop to
        # lax.fori_loop over wblk[i] to keep the steady-state body compact.
        for i in range(block_num):
            u = jnp.dot(wblk[i, 0], h.astype(matmul_dtype),
                        preferred_element_type=jnp.float32)
            u = jnp.maximum(u, 0.0).astype(matmul_dtype)
            t = jnp.dot(wblk[i, 1], u, preferred_element_type=jnp.float32)
            t = jnp.maximum(t, 0.0).astype(chain_dtype)
            h = h + t
        # end: 1x1 conv (no activation), bias folded in via the ones channel.
        return jnp.dot(we, h.astype(matmul_dtype),
                       preferred_element_type=jnp.float32)

    def run_chunk(b, start):
        o_ref[b, :, pl.ds(start, chunk)] = compute(x_ref[b, :, pl.ds(start, chunk)])

    for b in range(b_blk):                           # b_blk is small & static
        if npairs > 0:
            def pair_body(p, carry, b=b):
                s0 = pl.multiple_of(p * (2 * chunk), LANE)
                s1 = pl.multiple_of(p * (2 * chunk) + chunk, LANE)

                def run_pair():
                    # Two independent chains per iteration keep the MXU fed while
                    # each chain's serial dot->relu->dot latency drains.
                    run_chunk(b, s0)
                    run_chunk(b, s1)

                if maybe_partial:
                    pl.when(s0 < valid)(run_pair)    # skip dead chunk pairs
                else:
                    run_pair()
                return carry

            lax.fori_loop(0, npairs, pair_body, 0)

        if nchunks % 2 == 1:
            s_tail = (nchunks - 1) * chunk           # static

            def run_tail(b=b, s_tail=s_tail):
                run_chunk(b, s_tail)

            if maybe_partial:
                pl.when(s_tail < valid)(run_tail)
            else:
                run_tail()


def refinement_pallas(x_nchw, params, *, block_num,
                      matmul_dtype=jnp.bfloat16, chain_dtype=jnp.float32,
                      ts_target=TS_TARGET, chunk_target=CHUNK):
    """Apply refinement() to an NCHW float32 input using a Pallas TPU kernel."""
    n, cin, hh, ww = x_nchw.shape
    hw = hh * ww
    cout = params["w_end"].shape[0]

    # Free, contiguous reshape: channels on sublanes, H*W on lanes, per batch.
    x = x_nchw.reshape(n, cin, hw)
    hw_pad = ((hw + LANE - 1) // LANE) * LANE
    if hw_pad != hw:
        # One cheap zero-pad keeps every lane tile 128-aligned (avoids the
        # unbounded-chunk / spill cliff for odd H*W).
        x = jnp.pad(x, ((0, 0), (0, 0), (0, hw_pad - hw)))

    ts, chunk = _choose_tiles(hw_pad, ts_target, chunk_target)

    # Cap the lane tile by a conservative VMEM budget (double-buffered in + out).
    bytes_per_lane = (cin + cout) * 4 * 2
    ts_cap = max(chunk, (VMEM_BUDGET // bytes_per_lane) // chunk * chunk)
    ts = min(ts, ts_cap)

    # Keep enough grid steps for both v7x TensorCores, but never shrink tiles
    # below ~2048 lanes (per-step overhead would dominate again).
    n_hw = pl.cdiv(hw_pad, ts)
    min_ts = max(chunk, min(2048, hw_pad))
    while ts > min_ts and n * n_hw < MIN_STEPS:
        ts = max(min_ts, (ts // 2) // chunk * chunk)
        n_hw = pl.cdiv(hw_pad, ts)

    # For small H*W, amortize per-step pipeline overhead over several batch
    # elements per grid step.
    b_blk = 1
    if n_hw == 1 and n > 1:
        min_after = 2 if n >= 4 else 1
        max_b = min(n, max(1, ts_target // hw_pad),
                    max(1, VMEM_BUDGET // (bytes_per_lane * hw_pad)))
        for cand in range(max_b, 0, -1):
            if n % cand == 0 and (n // cand) >= min_after:
                b_blk = cand
                break

    maybe_partial = (hw_pad % ts) != 0

    # Fold all biases except `begin`'s into the weights through a constant "ones"
    # channel (index MIDDLE) carried in the hidden state, and zero-pad the middle
    # channels 30 -> 32.  Mathematically exact; removes every per-chunk bias
    # broadcast / add from the block and end convs.
    mid = MIDDLE
    w_begin = jnp.zeros((MID_PAD, cin), jnp.float32).at[:mid].set(params["w_begin"])
    b_begin = (jnp.zeros((MID_PAD, 1), jnp.float32)
               .at[:mid, 0].set(params["b_begin"])
               .at[mid, 0].set(1.0))                         # ones channel source
    w_blk = jnp.zeros((block_num, 2, MID_PAD, MID_PAD), jnp.float32)
    w_blk = w_blk.at[:, :, :mid, :mid].set(params["w_blocks"])
    w_blk = w_blk.at[:, :, :mid, mid].set(params["b_blocks"])  # biases as a column
    w_blk = w_blk.at[:, 0, mid, mid].set(1.0)    # conv0 of each block propagates 1
    w_end = jnp.zeros((cout, MID_PAD), jnp.float32)
    w_end = w_end.at[:, :mid].set(params["w_end"])
    w_end = w_end.at[:, mid].set(params["b_end"])

    w_begin = w_begin.astype(matmul_dtype)
    w_blk = w_blk.astype(matmul_dtype)
    w_end = w_end.astype(matmul_dtype)

    kernel = functools.partial(
        _refinement_kernel, block_num=block_num, chunk=chunk, hw_total=hw_pad,
        maybe_partial=maybe_partial, matmul_dtype=matmul_dtype,
        chain_dtype=chain_dtype)

    out = pl.pallas_call(
        kernel,
        out_shape=jax.ShapeDtypeStruct((n, cout, hw_pad), jnp.float32),
        grid_spec=pltpu.PrefetchScalarGridSpec(
            num_scalar_prefetch=0,
            grid=(n // b_blk, n_hw),
            in_specs=[
                pl.BlockSpec((b_blk, cin, ts), lambda b, j: (b, 0, j)),       # x tile
                pl.BlockSpec((MID_PAD, cin), lambda b, j: (0, 0)),            # w_begin
                pl.BlockSpec((MID_PAD, 1), lambda b, j: (0, 0)),              # b_begin
                pl.BlockSpec((block_num, 2, MID_PAD, MID_PAD),
                             lambda b, j: (0, 0, 0, 0)),                      # block weights
                pl.BlockSpec((cout, MID_PAD), lambda b, j: (0, 0)),           # w_end
            ],
            out_specs=pl.BlockSpec((b_blk, cout, ts), lambda b, j: (b, 0, j)),
        ),
        compiler_params=pltpu.CompilerParams(
            dimension_semantics=("parallel", "parallel")),
    )(x, w_begin, b_begin, w_blk, w_end)

    if hw_pad != hw:
        out = out[:, :, :hw]
    return out.reshape(n, cout, hh, ww)


def refinement_reference(x_nchw, params, *, block_num):
    """Plain-JAX reference mirroring the PyTorch forward pass."""
    def conv1x1(x, w, b):
        return jnp.einsum("oc,nchw->nohw", w, x) + b[None, :, None, None]

    h = conv1x1(x_nchw, params["w_begin"], params["b_begin"])
    for i in range(block_num):
        t = jax.nn.relu(conv1x1(h, params["w_blocks"][i, 0], params["b_blocks"][i, 0]))
        t = jax.nn.relu(conv1x1(t, params["w_blocks"][i, 1], params["b_blocks"][i, 1]))
        h = h + t
    return conv1x1(h, params["w_end"], params["b_end"])


def make_params(key, input_channel, output_channel, block_num):
    ks = jax.random.split(key, 6)
    scale = 0.1
    return {
        "w_begin": scale * jax.random.normal(ks[0], (MIDDLE, input_channel), jnp.float32),
        "b_begin": scale * jax.random.normal(ks[1], (MIDDLE,), jnp.float32),
        "w_blocks": scale * jax.random.normal(ks[2], (block_num, 2, MIDDLE, MIDDLE), jnp.float32),
        "b_blocks": scale * jax.random.normal(ks[3], (block_num, 2, MIDDLE), jnp.float32),
        "w_end": scale * jax.random.normal(ks[4], (output_channel, MIDDLE), jnp.float32),
        "b_end": scale * jax.random.normal(ks[5], (output_channel,), jnp.float32),
    }


if __name__ == "__main__":
    key = jax.random.PRNGKey(0)
    k_x, k_p, k_x2, k_p2, k_x3, k_x4 = jax.random.split(key, 6)

    # --- main example: batch=2, channels 4 -> 6, 16x16 spatial, 2 res blocks ---
    N, Cin, Cout, H, W = 2, 4, 6, 16, 16
    BLOCK_NUM = 2
    x = jax.random.normal(k_x, (N, Cin, H, W), jnp.float32)
    params = make_params(k_p, Cin, Cout, BLOCK_NUM)
    ref = refinement_reference(x, params, block_num=BLOCK_NUM)

    # f32 matmul path: tight numerical check of the kernel structure.
    out_f32 = jax.block_until_ready(
        refinement_pallas(x, params, block_num=BLOCK_NUM, matmul_dtype=jnp.float32))
    assert out_f32.shape == (N, Cout, H, W)
    assert jnp.allclose(out_f32, ref, atol=1e-4, rtol=1e-4), "f32 path mismatch"

    # bf16 matmul path (default / fast): looser tolerance (f32 accumulation).
    out = jax.block_until_ready(refinement_pallas(x, params, block_num=BLOCK_NUM))
    assert out.shape == (N, Cout, H, W)
    assert jnp.allclose(out, ref, atol=5e-2, rtol=5e-2), "bf16 path mismatch"

    # --- H*W not a multiple of 128 (wrapper pad path) + batch blocking ---
    x2 = jax.random.normal(k_x2, (2, 5, 12, 11), jnp.float32)
    p2 = make_params(k_p2, 5, 7, 3)
    o2 = jax.block_until_ready(
        refinement_pallas(x2, p2, block_num=3, matmul_dtype=jnp.float32))
    assert jnp.allclose(o2, refinement_reference(x2, p2, block_num=3),
                        atol=1e-4, rtol=1e-4), "pad path mismatch"

    # --- multi-chunk fori_loop / 2-way interleave path ---
    x3 = jax.random.normal(k_x3, (2, Cin, 32, 32), jnp.float32)
    o3 = jax.block_until_ready(
        refinement_pallas(x3, params, block_num=BLOCK_NUM, matmul_dtype=jnp.float32))
    assert jnp.allclose(o3, refinement_reference(x3, params, block_num=BLOCK_NUM),
                        atol=1e-4, rtol=1e-4), "chunk-loop path mismatch"

    # --- partial last lane tile (dead-chunk skip via pl.when) ---
    x4 = jax.random.normal(k_x4, (2, Cin, 16, 40), jnp.float32)
    o4 = jax.block_until_ready(
        refinement_pallas(x4, params, block_num=BLOCK_NUM, matmul_dtype=jnp.float32,
                          ts_target=512))
    assert jnp.allclose(o4, refinement_reference(x4, params, block_num=BLOCK_NUM),
                        atol=1e-4, rtol=1e-4), "partial-tile path mismatch"

    print("KERNEL_OK")
</pallas_src>

<mosaic_0001>
module attributes {stable_mosaic.version = 11 : i64} {
  func.func @_refinement_kernel(%arg0: i32, %arg1: i32, %arg2: memref<2x4x256xf32, #tpu.memory_space<vmem>>, %arg3: memref<32x4xf32, #tpu.memory_space<vmem>>, %arg4: memref<32x1xf32, #tpu.memory_space<vmem>>, %arg5: memref<2x2x32x32xf32, #tpu.memory_space<vmem>>, %arg6: memref<6x32xf32, #tpu.memory_space<vmem>>, %arg7: memref<2x6x256xf32, #tpu.memory_space<vmem>>) attributes {dimension_semantics = [#tpu.dimension_semantics<parallel>, #tpu.dimension_semantics<parallel>], iteration_bounds = array<i64: 1, 1>, scalar_prefetch = 0 : i64, scratch_operands = 0 : i64, tpu.core_type = #tpu.core_type<tc>, window_params = [{transform_indices = @transform_0, window_bounds = array<i64: 2, 4, 256>}, {pipeline_mode = #tpu.pipeline_mode<synchronous>, transform_indices = @transform_1, window_bounds = array<i64: 32, 4>}, {pipeline_mode = #tpu.pipeline_mode<synchronous>, transform_indices = @transform_2, window_bounds = array<i64: 32, 1>}, {pipeline_mode = #tpu.pipeline_mode<synchronous>, transform_indices = @transform_3, window_bounds = array<i64: 2, 2, 32, 32>}, {pipeline_mode = #tpu.pipeline_mode<synchronous>, transform_indices = @transform_4, window_bounds = array<i64: 6, 32>}, {transform_indices = @transform_5, window_bounds = array<i64: 2, 6, 256>}]} {
    %c0 = arith.constant 0 : index
    %c0_0 = arith.constant 0 : index
    %0 = vector.load %arg3[%c0, %c0_0] : memref<32x4xf32, #tpu.memory_space<vmem>>, vector<32x4xf32>
    %c0_1 = arith.constant 0 : index
    %c0_2 = arith.constant 0 : index
    %c0_3 = arith.constant 0 : index
    %c0_4 = arith.constant 0 : index
    %1 = vector.load %arg5[%c0_1, %c0_2, %c0_3, %c0_4] : memref<2x2x32x32xf32, #tpu.memory_space<vmem>>, vector<2x2x32x32xf32>
    %c0_5 = arith.constant 0 : index
    %c0_6 = arith.constant 0 : index
    %2 = vector.load %arg6[%c0_5, %c0_6] : memref<6x32xf32, #tpu.memory_space<vmem>>, vector<6x32xf32>
    %c0_7 = arith.constant 0 : index
    %c0_8 = arith.constant 0 : index
    %3 = vector.load %arg4[%c0_7, %c0_8] : memref<32x1xf32, #tpu.memory_space<vmem>>, vector<32x1xf32>
    %4 = vector.shape_cast %3 : vector<32x1xf32> to vector<32x1xf32>
    %5 = vector.broadcast %4 : vector<32x1xf32> to vector<32x256xf32>
    %c0_9 = arith.constant 0 : index
    %c0_10 = arith.constant 0 : index
    %c0_11 = arith.constant 0 : index
    %6 = vector.load %arg2[%c0_9, %c0_10, %c0_11] : memref<2x4x256xf32, #tpu.memory_space<vmem>>, vector<1x4x256xf32>
    %7 = vector.shape_cast %6 : vector<1x4x256xf32> to vector<4x256xf32>
    %cst = arith.constant dense<0.000000e+00> : vector<32x256xf32>
    %8 = tpu.matmul %0, %7, %cst {dimension_numbers = #tpu.dot_dimension_numbers<[1], [0], [0], [1], [0, 0, 1, 1], [], []>} : vector<32x4xf32>, vector<4x256xf32>, vector<32x256xf32> -> vector<32x256xf32>
    %9 = arith.addf %8, %5 : vector<32x256xf32>
    %10 = vector.extract_strided_slice %1 {offsets = [0, 0, 0, 0], sizes = [1, 1, 32, 32], strides = [1, 1, 1, 1]} : vector<2x2x32x32xf32> to vector<1x1x32x32xf32>
    %11 = vector.shape_cast %10 : vector<1x1x32x32xf32> to vector<32x32xf32>
    %cst_12 = arith.constant dense<0.000000e+00> : vector<32x256xf32>
    %12 = tpu.matmul %11, %9, %cst_12 {dimension_numbers = #tpu.dot_dimension_numbers<[1], [0], [0], [1], [0, 0, 1, 1], [], []>} : vector<32x32xf32>, vector<32x256xf32>, vector<32x256xf32> -> vector<32x256xf32>
    %cst_13 = arith.constant 0.000000e+00 : f32
    %13 = vector.broadcast %cst_13 : f32 to vector<32x256xf32>
    %14 = arith.maximumf %12, %13 : vector<32x256xf32>
    %15 = vector.extract_strided_slice %1 {offsets = [0, 1, 0, 0], sizes = [1, 1, 32, 32], strides = [1, 1, 1, 1]} : vector<2x2x32x32xf32> to vector<1x1x32x32xf32>
    %16 = vector.shape_cast %15 : vector<1x1x32x32xf32> to vector<32x32xf32>
    %cst_14 = arith.constant dense<0.000000e+00> : vector<32x256xf32>
    %17 = tpu.matmul %16, %14, %cst_14 {dimension_numbers = #tpu.dot_dimension_numbers<[1], [0], [0], [1], [0, 0, 1, 1], [], []>} : vector<32x32xf32>, vector<32x256xf32>, vector<32x256xf32> -> vector<32x256xf32>
    %cst_15 = arith.constant 0.000000e+00 : f32
    %18 = vector.broadcast %cst_15 : f32 to vector<32x256xf32>
    %19 = arith.maximumf %17, %18 : vector<32x256xf32>
    %20 = arith.addf %9, %19 : vector<32x256xf32>
    %21 = vector.extract_strided_slice %1 {offsets = [1, 0, 0, 0], sizes = [1, 1, 32, 32], strides = [1, 1, 1, 1]} : vector<2x2x32x32xf32> to vector<1x1x32x32xf32>
    %22 = vector.shape_cast %21 : vector<1x1x32x32xf32> to vector<32x32xf32>
    %cst_16 = arith.constant dense<0.000000e+00> : vector<32x256xf32>
    %23 = tpu.matmul %22, %20, %cst_16 {dimension_numbers = #tpu.dot_dimension_numbers<[1], [0], [0], [1], [0, 0, 1, 1], [], []>} : vector<32x32xf32>, vector<32x256xf32>, vector<32x256xf32> -> vector<32x256xf32>
    %cst_17 = arith.constant 0.000000e+00 : f32
    %24 = vector.broadcast %cst_17 : f32 to vector<32x256xf32>
    %25 = arith.maximumf %23, %24 : vector<32x256xf32>
    %26 = vector.extract_strided_slice %1 {offsets = [1, 1, 0, 0], sizes = [1, 1, 32, 32], strides = [1, 1, 1, 1]} : vector<2x2x32x32xf32> to vector<1x1x32x32xf32>
    %27 = vector.shape_cast %26 : vector<1x1x32x32xf32> to vector<32x32xf32>
    %cst_18 = arith.constant dense<0.000000e+00> : vector<32x256xf32>
    %28 = tpu.matmul %27, %25, %cst_18 {dimension_numbers = #tpu.dot_dimension_numbers<[1], [0], [0], [1], [0, 0, 1, 1], [], []>} : vector<32x32xf32>, vector<32x256xf32>, vector<32x256xf32> -> vector<32x256xf32>
    %cst_19 = arith.constant 0.000000e+00 : f32
    %29 = vector.broadcast %cst_19 : f32 to vector<32x256xf32>
    %30 = arith.maximumf %28, %29 : vector<32x256xf32>
    %31 = arith.addf %20, %30 : vector<32x256xf32>
    %cst_20 = arith.constant dense<0.000000e+00> : vector<6x256xf32>
    %32 = tpu.matmul %2, %31, %cst_20 {dimension_numbers = #tpu.dot_dimension_numbers<[1], [0], [0], [1], [0, 0, 1, 1], [], []>} : vector<6x32xf32>, vector<32x256xf32>, vector<6x256xf32> -> vector<6x256xf32>
    %c0_21 = arith.constant 0 : index
    %c0_22 = arith.constant 0 : index
    %c0_23 = arith.constant 0 : index
    %33 = vector.load %arg7[%c0_21, %c0_22, %c0_23] : memref<2x6x256xf32, #tpu.memory_space<vmem>>, vector<1x6x256xf32>
    %34 = vector.shape_cast %33 : vector<1x6x256xf32> to vector<6x256xf32>
    %35 = vector.shape_cast %32 : vector<6x256xf32> to vector<1x6x256xf32>
    tpu.vector_store %arg7[%c0_21, %c0_22, %c0_23], %35 {strides = array<i32>} : memref<2x6x256xf32, #tpu.memory_space<vmem>>, vector<1x6x256xf32>,
    %c1 = arith.constant 1 : index
    %c0_24 = arith.constant 0 : index
    %c0_25 = arith.constant 0 : index
    %36 = vector.load %arg2[%c1, %c0_24, %c0_25] : memref<2x4x256xf32, #tpu.memory_space<vmem>>, vector<1x4x256xf32>
    %37 = vector.shape_cast %36 : vector<1x4x256xf32> to vector<4x256xf32>
    %cst_26 = arith.constant dense<0.000000e+00> : vector<32x256xf32>
    %38 = tpu.matmul %0, %37, %cst_26 {dimension_numbers = #tpu.dot_dimension_numbers<[1], [0], [0], [1], [0, 0, 1, 1], [], []>} : vector<32x4xf32>, vector<4x256xf32>, vector<32x256xf32> -> vector<32x256xf32>
    %39 = arith.addf %38, %5 : vector<32x256xf32>
    %40 = vector.extract_strided_slice %1 {offsets = [0, 0, 0, 0], sizes = [1, 1, 32, 32], strides = [1, 1, 1, 1]} : vector<2x2x32x32xf32> to vector<1x1x32x32xf32>
    %41 = vector.shape_cast %40 : vector<1x1x32x32xf32> to vector<32x32xf32>
    %cst_27 = arith.constant dense<0.000000e+00> : vector<32x256xf32>
    %42 = tpu.matmul %41, %39, %cst_27 {dimension_numbers = #tpu.dot_dimension_numbers<[1], [0], [0], [1], [0, 0, 1, 1], [], []>} : vector<32x32xf32>, vector<32x256xf32>, vector<32x256xf32> -> vector<32x256xf32>
    %cst_28 = arith.constant 0.000000e+00 : f32
    %43 = vector.broadcast %cst_28 : f32 to vector<32x256xf32>
    %44 = arith.maximumf %42, %43 : vector<32x256xf32>
    %45 = vector.extract_strided_slice %1 {offsets = [0, 1, 0, 0], sizes = [1, 1, 32, 32], strides = [1, 1, 1, 1]} : vector<2x2x32x32xf32> to vector<1x1x32x32xf32>
    %46 = vector.shape_cast %45 : vector<1x1x32x32xf32> to vector<32x32xf32>
    %cst_29 = arith.constant dense<0.000000e+00> : vector<32x256xf32>
    %47 = tpu.matmul %46, %44, %cst_29 {dimension_numbers = #tpu.dot_dimension_numbers<[1], [0], [0], [1], [0, 0, 1, 1], [], []>} : vector<32x32xf32>, vector<32x256xf32>, vector<32x256xf32> -> vector<32x256xf32>
    %cst_30 = arith.constant 0.000000e+00 : f32
    %48 = vector.broadcast %cst_30 : f32 to vector<32x256xf32>
    %49 = arith.maximumf %47, %48 : vector<32x256xf32>
    %50 = arith.addf %39, %49 : vector<32x256xf32>
    %51 = vector.extract_strided_slice %1 {offsets = [1, 0, 0, 0], sizes = [1, 1, 32, 32], strides = [1, 1, 1, 1]} : vector<2x2x32x32xf32> to vector<1x1x32x32xf32>
    %52 = vector.shape_cast %51 : vector<1x1x32x32xf32> to vector<32x32xf32>
    %cst_31 = arith.constant dense<0.000000e+00> : vector<32x256xf32>
    %53 = tpu.matmul %52, %50, %cst_31 {dimension_numbers = #tpu.dot_dimension_numbers<[1], [0], [0], [1], [0, 0, 1, 1], [], []>} : vector<32x32xf32>, vector<32x256xf32>, vector<32x256xf32> -> vector<32x256xf32>
    %cst_32 = arith.constant 0.000000e+00 : f32
    %54 = vector.broadcast %cst_32 : f32 to vector<32x256xf32>
    %55 = arith.maximumf %53, %54 : vector<32x256xf32>
    %56 = vector.extract_strided_slice %1 {offsets = [1, 1, 0, 0], sizes = [1, 1, 32, 32], strides = [1, 1, 1, 1]} : vector<2x2x32x32xf32> to vector<1x1x32x32xf32>
    %57 = vector.shape_cast %56 : vector<1x1x32x32xf32> to vector<32x32xf32>
    %cst_33 = arith.constant dense<0.000000e+00> : vector<32x256xf32>
    %58 = tpu.matmul %57, %55, %cst_33 {dimension_numbers = #tpu.dot_dimension_numbers<[1], [0], [0], [1], [0, 0, 1, 1], [], []>} : vector<32x32xf32>, vector<32x256xf32>, vector<32x256xf32> -> vector<32x256xf32>
    %cst_34 = arith.constant 0.000000e+00 : f32
    %59 = vector.broadcast %cst_34 : f32 to vector<32x256xf32>
    %60 = arith.maximumf %58, %59 : vector<32x256xf32>
    %61 = arith.addf %50, %60 : vector<32x256xf32>
    %cst_35 = arith.constant dense<0.000000e+00> : vector<6x256xf32>
    %62 = tpu.matmul %2, %61, %cst_35 {dimension_numbers = #tpu.dot_dimension_numbers<[1], [0], [0], [1], [0, 0, 1, 1], [], []>} : vector<6x32xf32>, vector<32x256xf32>, vector<6x256xf32> -> vector<6x256xf32>
    %c1_36 = arith.constant 1 : index
    %c0_37 = arith.constant 0 : index
    %c0_38 = arith.constant 0 : index
    %63 = vector.load %arg7[%c1_36, %c0_37, %c0_38] : memref<2x6x256xf32, #tpu.memory_space<vmem>>, vector<1x6x256xf32>
    %64 = vector.shape_cast %63 : vector<1x6x256xf32> to vector<6x256xf32>
    %65 = vector.shape_cast %62 : vector<6x256xf32> to vector<1x6x256xf32>
    tpu.vector_store %arg7[%c1_36, %c0_37, %c0_38], %65 {strides = array<i32>} : memref<2x6x256xf32, #tpu.memory_space<vmem>>, vector<1x6x256xf32>,
    return
  }
  func.func @transform_0(%arg0: i32, %arg1: i32) -> (i32, i32, i32) {
    %c0_i32 = arith.constant 0 : i32
    %c0_i32_0 = arith.constant 0 : i32
    return %arg0, %c0_i32, %arg1 : i32, i32, i32
  }
  func.func @transform_1(%arg0: i32, %arg1: i32) -> (i32, i32) {
    %c0_i32 = arith.constant 0 : i32
    %c0_i32_0 = arith.constant 0 : i32
    %c0_i32_1 = arith.constant 0 : i32
    return %c0_i32, %c0_i32_0 : i32, i32
  }
  func.func @transform_2(%arg0: i32, %arg1: i32) -> (i32, i32) {
    %c0_i32 = arith.constant 0 : i32
    %c0_i32_0 = arith.constant 0 : i32
    %c0_i32_1 = arith.constant 0 : i32
    return %c0_i32, %c0_i32_0 : i32, i32
  }
  func.func @transform_3(%arg0: i32, %arg1: i32) -> (i32, i32, i32, i32) {
    %c0_i32 = arith.constant 0 : i32
    %c0_i32_0 = arith.constant 0 : i32
    %c0_i32_1 = arith.constant 0 : i32
    %c0_i32_2 = arith.constant 0 : i32
    %c0_i32_3 = arith.constant 0 : i32
    return %c0_i32, %c0_i32_0, %c0_i32_1, %c0_i32_2 : i32, i32, i32, i32
  }
  func.func @transform_4(%arg0: i32, %arg1: i32) -> (i32, i32) {
    %c0_i32 = arith.constant 0 : i32
    %c0_i32_0 = arith.constant 0 : i32
    %c0_i32_1 = arith.constant 0 : i32
    return %c0_i32, %c0_i32_0 : i32, i32
  }
  func.func @transform_5(%arg0: i32, %arg1: i32) -> (i32, i32, i32) {
    %c0_i32 = arith.constant 0 : i32
    %c0_i32_0 = arith.constant 0 : i32
    return %arg0, %c0_i32, %arg1 : i32, i32, i32
  }
}

</mosaic_0001>

<bundles_post_ra>
// kernel: tpu_custom_call.1
= control target key start
LH: loop header
LB: loop body
LE: loop exit
PB: predicated region body
PF: predicated region fallthrough
CT: control target
= control target key end

     0   :  { %10 = vsyncpa [#allocation3], 0  ;;  %s1378_s18 = smov [#allocation2]   ;;  %s1785_s0 = inlined_call_operand.vmem [shape: f32[2,4,256], index: 0, kind: input, shape index: {}]   ;;  %s1786_s1 = inlined_call_operand.vmem [shape: f32[32,4], index: 1, kind: input, shape index: {}]   ;;  %s1787_s2 = inlined_call_operand.vmem [shape: f32[32,1], index: 2, kind: input, shape index: {}]   ;;  %s1788_s3 = inlined_call_operand.hbm [shape: f32[2,2,32,32], index: 3, kind: input, shape index: {}]   ;;  %s1789_s4 = inlined_call_operand.vmem [shape: f32[6,32], index: 4, kind: input, shape index: {}]   ;;  %s1790_s5 = inlined_call_operand.vmem [shape: f32[2,6,256], index: 5, kind: output, shape index: {}]  }
   0x1   :  { %s22_s19 = sshll.u32 %s1378_s18, 4  ;;  %s23_s19 = int_to_ptr.vmem [resolvable:$true] %s22_s19 }
   0x2   :  { %s1364_s20 = scalar_lea.vmem %s23_s19, 2048  ;;  %p1369_p1 = scmp.lt.s32.totalorder %s23_s19, %s23_s19 }
   0x3   :  { %p1365_p0 = scmp.ne.s32.totalorder %s23_s19, %s1364_s20  ;;  %p1370_p2 = scmp.lt.s32.totalorder %s1364_s20, %s1364_s20 }
   0x5   :  { %p1371_p3 = por %p1370_p2, %p1369_p1 }
   0x7   :  { %p1372_p4 = pnand %p1371_p3, %p1365_p0 }
   0x9   :  { %1375 = shalt.err (!%p1372_p4)
}
   0xa   :  { %s1379_s21 = smov 128   ;;  %s1380_s22 = smov 8  }
   0xb   :  { %28 = dma.hbm_to_vmem [thread:$0]  %s1788_s3, 2048, %s23_s19, [#allocation3], %s1379_s21, %s1379_s21, %s1380_s22  }
   0xc   :  { %1376 = dma.done.wait [#allocation3], 2048  }
   0xd   :  { %1377 = vsyncadd [#allocation3], 4294965248  ;;  %v1381_v0 = vmov 0.0   ;;  %v1382_v1 = vmov 0   ;;  %v79_v2 = vld [vmem:[%s1785_s0] sm:$0xff]  ;;  %vm95_vm0 = vcmask 1043456  }
   0xe   :  { %164 = vmatprep.mubr.f32.mxu0 %v1381_v0  ;;  %1353 = vset.pattern.permute.xlu1 %v1382_v1  ;;  %v81_v3 = vcombine.high %v79_v2, %v79_v2  ;;  %v56_v4 = vld [vmem:[%s1787_s2 + $0x8] sm:$0xff]  ;;  %v1427_v5 = vld [vmem:[%s1786_s1] sm:$0xff]  ;;  %vm82_vm1 = vcmask 31744   ;;  %v58_v6 = vld [vmem:[%s1787_s2 + $0x18] sm:$0xff]  ;;  %vm189_vm2 = vcmask 261120  }
   0xf   :  { %1352 = vset.pattern.permute.xlu0 %v1382_v1  ;;  %266 = vmatprep.mubr.f32.mxu1 %v1381_v0  ;;  %v55_v7 = vld [vmem:[%s1787_s2] sm:$0xff]  ;;  %v57_v8 = vld [vmem:[%s1787_s2 + $0x10] sm:$0xff]  ;;  %v1446_v9 = vld [vmem:[%s1786_s1 + $0x8] sm:$0xff] }
  0x10   :  { %66 = vperm.xlu1 %1353, %v56_v4   ;;  %1298 = vmatprep.subr.msk.mxu0 %vm95_vm0, %v81_v3  ;;  %v1454_v10 = vld [vmem:[%s1786_s1 + $0x10] sm:$0xff]  ;;  %v1462_v11 = vld [vmem:[%s1786_s1 + $0x18] sm:$0xff]  ;;  %v1505_v32 = vld [vmem:[#allocation2] sm:$0xff] }
  0x11   :  { %76 = vperm.xlu0 %1352, %v58_v6   ;;  %1299 = vmatpush1.msk.msra.mxu0 %vm95_vm0, %v79_v2  ;;  %v1512_v33 = vld [vmem:[#allocation2 + $0x8] sm:$0xff]  ;;  %v1517_v34 = vld [vmem:[#allocation2 + $0x10] sm:$0xff]  ;;  %v1522_v35 = vld [vmem:[#allocation2 + $0x18] sm:$0xff] }
  0x12   :  { %1300 = vmatmul.mubr.msk.f32.vlgmr.msra.gmra.mxu0 %vm82_vm1, %v1427_v5  ;;  %v1527_v52 = vld [vmem:[#allocation2 + $0x20] sm:$0xff]  ;;  %v1532_v53 = vld [vmem:[#allocation2 + $0x28] sm:$0xff]  ;;  %v1537_v54 = vld [vmem:[#allocation2 + $0x30] sm:$0xff] }
  0x13   :  { %170 = vmatprep.mubr.f32.mxu0 %v1381_v0  ;;  %v1542_v55 = vld [vmem:[#allocation2 + $0x38] sm:$0xff] }
  0x14   :  { %61 = vperm.xlu1 %1353, %v55_v7  }
  0x15   :  { %71 = vperm.xlu0 %1352, %v57_v8  }
  0x16   :  { %1301 = vmatmul.mubr.msk.f32.gmra.mxu0 %vm82_vm1, %v1446_v9 }
  0x17   :  { %176 = vmatprep.mubr.f32.mxu0 %v1381_v0 }
  0x1a   :  { %1302 = vmatmul.mubr.msk.f32.gmra.mxu0 %vm82_vm1, %v1454_v10 }
  0x1b   :  { %182 = vmatprep.mubr.f32.mxu0 %v1381_v0 }
  0x1e   :  { %1303 = vmatmul.mubr.msk.f32.gmra.mxu0 %vm82_vm1, %v1462_v11 }
  0x1f   :  { %375 = vmatprep.mubr.f32.mxu0 %v1381_v0 }
  0x8b   :  { %v1469_v20 = vpop.permute.xlu1 %66 }
  0x8c   :  { %v1467_v17 = vpop.permute.xlu0 %76 }
  0x8f   :  { %v1487_v27 = vpop.permute.xlu1 %61 }
  0x90   :  { %v1471_v22 = vpop.permute.xlu0 %71 }
  0xd2   :  { %v166_v12 = vpop.f32.mrf.mxu0 }
  0xd3   :  { %v1502_v31 = vadd.f32 %v166_v12, %v1487_v27 }
  0xd4   :  { %v168_v13 = vpop.f32.mrf.mxu0 }
  0xd5   :  { %v1498_v30 = vadd.f32 %v168_v13, %v1487_v27 }
  0xd6   :  { %v172_v14 = vpop.f32.mrf.mxu0 }
  0xd7   :  { %v1494_v29 = vadd.f32 %v172_v14, %v1469_v20 }
  0xd8   :  { %v174_v15 = vpop.f32.mrf.mxu0 }
  0xd9   :  { %v1490_v28 = vadd.f32 %v174_v15, %v1469_v20 }
  0xda   :  { %v178_v16 = vpop.f32.mrf.mxu0 }
  0xdb   :  { %v1484_v26 = vadd.f32 %v178_v16, %v1471_v22 }
  0xdc   :  { %v180_v18 = vpop.f32.mrf.mxu0 }
  0xdd   :  { %v1480_v25 = vadd.f32 %v180_v18, %v1471_v22 }
  0xde   :  { %v184_v19 = vpop.f32.mrf.mxu0 }
  0xdf   :  { %v1477_v24 = vadd.f32 %v184_v19, %v1467_v17 }
  0xe0   :  { %v186_v21 = vpop.f32.mrf.mxu0 }
  0xe1   :  { %v1474_v23 = vadd.f32 %v186_v21, %v1467_v17 }
  0xe3   :  { %226 = vmatprep.subr.mxu1 %v1474_v23 }
  0xe4   :  { %227 = vmatpush1.msra.mxu1 %v1477_v24 }
  0xe5   :  { %228 = vmatprep.subr.mxu1 %v1480_v25 }
  0xe6   :  { %229 = vmatpush1.msra.mxu1 %v1484_v26 }
  0xe7   :  { %230 = vmatprep.subr.mxu1 %v1490_v28 }
  0xe8   :  { %231 = vmatpush1.msra.mxu1 %v1494_v29 }
  0xe9   :  { %232 = vmatprep.subr.mxu1 %v1498_v30 }
  0xea   :  { %233 = vmatpush1.msra.mxu1 %v1502_v31 }
  0xeb   :  { %1304 = vmatmul.mubr.msk.f32.vlgmr.msra.gmra.mxu1 %vm189_vm2, %v1505_v32 }
  0xec   :  { %272 = vmatprep.mubr.f32.mxu1 %v1381_v0 }
  0xef   :  { %1305 = vmatmul.mubr.msk.f32.gmra.mxu1 %vm189_vm2, %v1512_v33 }
  0xf0   :  { %278 = vmatprep.mubr.f32.mxu1 %v1381_v0 }
  0xf3   :  { %1306 = vmatmul.mubr.msk.f32.gmra.mxu1 %vm189_vm2, %v1517_v34 }
  0xf4   :  { %284 = vmatprep.mubr.f32.mxu1 %v1381_v0 }
  0xf7   :  { %1307 = vmatmul.mubr.msk.f32.gmra.mxu1 %vm189_vm2, %v1522_v35 }
  0xf8   :  { %492 = vmatprep.mubr.f32.mxu1 %v1381_v0 }
 0x1ab   :  { %v268_v36 = vpop.f32.mrf.mxu1 }
 0x1ac   :  { %v291_v51 = vmax.f32 %v268_v36, 0.0 }
 0x1ad   :  { %v270_v37 = vpop.f32.mrf.mxu1 }
 0x1ae   :  { %v292_v50 = vmax.f32 %v270_v37, 0.0 }
 0x1af   :  { %v274_v38 = vpop.f32.mrf.mxu1 }
 0x1b0   :  { %v293_v49 = vmax.f32 %v274_v38, 0.0 }
 0x1b1   :  { %v276_v39 = vpop.f32.mrf.mxu1 }
 0x1b2   :  { %v294_v48 = vmax.f32 %v276_v39, 0.0 }
 0x1b3   :  { %v280_v40 = vpop.f32.mrf.mxu1 }
 0x1b4   :  { %v295_v47 = vmax.f32 %v280_v40, 0.0 }
 0x1b5   :  { %v282_v41 = vpop.f32.mrf.mxu1 }
 0x1b6   :  { %v296_v46 = vmax.f32 %v282_v41, 0.0 }
 0x1b7   :  { %v286_v42 = vpop.f32.mrf.mxu1 }
 0x1b8   :  { %v297_v45 = vmax.f32 %v286_v42, 0.0 }
 0x1b9   :  { %v288_v43 = vpop.f32.mrf.mxu1 }
 0x1ba   :  { %v298_v44 = vmax.f32 %v288_v43, 0.0 }
 0x1bc   :  { %335 = vmatprep.subr.mxu0 %v298_v44 }
 0x1bd   :  { %336 = vmatpush1.msra.mxu0 %v297_v45 }
 0x1be   :  { %337 = vmatprep.subr.mxu0 %v296_v46 }
 0x1bf   :  { %338 = vmatpush1.msra.mxu0 %v295_v47 }
 0x1c0   :  { %339 = vmatprep.subr.mxu0 %v294_v48 }
 0x1c1   :  { %340 = vmatpush1.msra.mxu0 %v293_v49  ;;  %v1599_v49 = vld [vmem:[#allocation2 + $0x60] sm:$0xff] }
 0x1c2   :  { %341 = vmatprep.subr.mxu0 %v292_v50  ;;  %v1604_v50 = vld [vmem:[#allocation2 + $0x68] sm:$0xff] }
 0x1c3   :  { %342 = vmatpush1.msra.mxu0 %v291_v51  ;;  %v1609_v51 = vld [vmem:[#allocation2 + $0x70] sm:$0xff] }
 0x1c4   :  { %1308 = vmatmul.mubr.msk.f32.vlgmr.msra.gmra.mxu0 %vm189_vm2, %v1527_v52 }
 0x1c5   :  { %381 = vmatprep.mubr.f32.mxu0 %v1381_v0 }
 0x1c8   :  { %1309 = vmatmul.mubr.msk.f32.gmra.mxu0 %vm189_vm2, %v1532_v53 }
 0x1c9   :  { %387 = vmatprep.mubr.f32.mxu0 %v1381_v0 }
 0x1cc   :  { %1310 = vmatmul.mubr.msk.f32.gmra.mxu0 %vm189_vm2, %v1537_v54 }
 0x1cd   :  { %393 = vmatprep.mubr.f32.mxu0 %v1381_v0 }
 0x1d0   :  { %1311 = vmatmul.mubr.msk.f32.gmra.mxu0 %vm189_vm2, %v1542_v55 }
 0x1d1   :  { %601 = vmatprep.mubr.f32.mxu0 %v1381_v0 }
 0x284   :  { %v377_v56 = vpop.f32.mrf.mxu0 }
 0x285   :  { %v400_v15 = vmax.f32 %v377_v56, 0.0  ;;  %v1614_v56 = vld [vmem:[#allocation2 + $0x78] sm:$0xff] }
 0x286   :  { %v379_v57 = vpop.f32.mrf.mxu0 }
 0x287   :  { %v401_v13 = vmax.f32 %v379_v57, 0.0 }
 0x288   :  { %v383_v58 = vpop.f32.mrf.mxu0 }
 0x289   :  { %v402_v8 = vmax.f32 %v383_v58, 0.0  ;;  %v1570_v21 = vadd.f32 %v401_v13, %v1498_v30 }
 0x28a   :  { %v385_v59 = vpop.f32.mrf.mxu0 }
 0x28b   :  { %v403_v6 = vmax.f32 %v385_v59, 0.0  ;;  %v1566_v19 = vadd.f32 %v402_v8, %v1494_v29 }
 0x28c   :  { %v389_v60 = vpop.f32.mrf.mxu0 }
 0x28d   :  { %v404_v4 = vmax.f32 %v389_v60, 0.0  ;;  %v1562_v18 = vadd.f32 %v403_v6, %v1490_v28  ;;  %v1594_v28 = vld [vmem:[#allocation2 + $0x58] sm:$0xff] }
 0x28e   :  { %v391_v61 = vpop.f32.mrf.mxu0 }
 0x28f   :  { %v405_v2 = vmax.f32 %v391_v61, 0.0  ;;  %v1558_v16 = vadd.f32 %v404_v4, %v1484_v26  ;;  %v1589_v26 = vld [vmem:[#allocation2 + $0x50] sm:$0xff] }
 0x290   :  { %v395_v62 = vpop.f32.mrf.mxu0 }
 0x291   :  { %v406_v63 = vmax.f32 %v395_v62, 0.0  ;;  %v1554_v14 = vadd.f32 %v405_v2, %v1480_v25  ;;  %v1584_v25 = vld [vmem:[#allocation2 + $0x48] sm:$0xff] }
 0x292   :  { %v397_v1 = vpop.f32.mrf.mxu0 }
 0x293   :  { %v407_v3 = vmax.f32 %v397_v1, 0.0  ;;  %v1551_v12 = vadd.f32 %v406_v63, %v1477_v24  ;;  %v1577_v24 = vld [vmem:[#allocation2 + $0x40] sm:$0xff] }
 0x295   :  { %v1548_v7 = vadd.f32 %v407_v3, %v1474_v23  ;;  %v1574_v23 = vadd.f32 %v400_v15, %v1502_v31 }
 0x297   :  { %452 = vmatprep.subr.mxu1 %v1548_v7 }
 0x298   :  { %453 = vmatpush1.msra.mxu1 %v1551_v12 }
 0x299   :  { %454 = vmatprep.subr.mxu1 %v1554_v14 }
 0x29a   :  { %455 = vmatpush1.msra.mxu1 %v1558_v16 }
 0x29b   :  { %456 = vmatprep.subr.mxu1 %v1562_v18 }
 0x29c   :  { %457 = vmatpush1.msra.mxu1 %v1566_v19 }
 0x29d   :  { %458 = vmatprep.subr.mxu1 %v1570_v21 }
 0x29e   :  { %459 = vmatpush1.msra.mxu1 %v1574_v23 }
 0x29f   :  { %1312 = vmatmul.mubr.msk.f32.vlgmr.msra.gmra.mxu1 %vm189_vm2, %v1577_v24 }
 0x2a0   :  { %498 = vmatprep.mubr.f32.mxu1 %v1381_v0 }
 0x2a3   :  { %1313 = vmatmul.mubr.msk.f32.gmra.mxu1 %vm189_vm2, %v1584_v25 }
 0x2a4   :  { %504 = vmatprep.mubr.f32.mxu1 %v1381_v0 }
 0x2a7   :  { %1314 = vmatmul.mubr.msk.f32.gmra.mxu1 %vm189_vm2, %v1589_v26 }
 0x2a8   :  { %510 = vmatprep.mubr.f32.mxu1 %v1381_v0 }
 0x2ab   :  { %1315 = vmatmul.mubr.msk.f32.gmra.mxu1 %vm189_vm2, %v1594_v28 }
 0x2ac   :  { %709 = vmatprep.mubr.f32.mxu1 %v1381_v0 }
 0x35f   :  { %v494_v29 = vpop.f32.mrf.mxu1 }
 0x360   :  { %v517_v48 = vmax.f32 %v494_v29, 0.0 }
 0x361   :  { %v496_v30 = vpop.f32.mrf.mxu1 }
 0x362   :  { %v518_v47 = vmax.f32 %v496_v30, 0.0 }
 0x363   :  { %v500_v31 = vpop.f32.mrf.mxu1 }
 0x364   :  { %v519_v46 = vmax.f32 %v500_v31, 0.0 }
 0x365   :  { %v502_v36 = vpop.f32.mrf.mxu1 }
 0x366   :  { %v520_v45 = vmax.f32 %v502_v36, 0.0 }
 0x367   :  { %v506_v37 = vpop.f32.mrf.mxu1 }
 0x368   :  { %v521_v44 = vmax.f32 %v506_v37, 0.0 }
 0x369   :  { %v508_v38 = vpop.f32.mrf.mxu1 }
 0x36a   :  { %v522_v43 = vmax.f32 %v508_v38, 0.0  ;;  %v1321_v38 = vld [vmem:[%s1785_s0 + $0x8] sm:$0xff] }
 0x36b   :  { %v512_v39 = vpop.f32.mrf.mxu1 }
 0x36c   :  { %v523_v42 = vmax.f32 %v512_v39, 0.0 }
 0x36d   :  { %v514_v40 = vpop.f32.mrf.mxu1 }
 0x36e   :  { %v524_v41 = vmax.f32 %v514_v40, 0.0  ;;  %v721_v40 = vcombine.high %v1321_v38, %v1321_v38 }
 0x370   :  { %561 = vmatprep.subr.mxu0 %v524_v41 }
 0x371   :  { %562 = vmatpush1.msra.mxu0 %v523_v42 }
 0x372   :  { %563 = vmatprep.subr.mxu0 %v522_v43 }
 0x373   :  { %564 = vmatpush1.msra.mxu0 %v521_v44 }
 0x374   :  { %565 = vmatprep.subr.mxu0 %v520_v45 }
 0x375   :  { %566 = vmatpush1.msra.mxu0 %v519_v46 }
 0x376   :  { %567 = vmatprep.subr.mxu0 %v518_v47 }
 0x377   :  { %568 = vmatpush1.msra.mxu0 %v517_v48 }
 0x378   :  { %1316 = vmatmul.mubr.msk.f32.vlgmr.msra.gmra.mxu0 %vm189_vm2, %v1599_v49 }
 0x379   :  { %607 = vmatprep.mubr.f32.mxu0 %v1381_v0 }
 0x37c   :  { %1317 = vmatmul.mubr.msk.f32.gmra.mxu0 %vm189_vm2, %v1604_v50 }
 0x37d   :  { %613 = vmatprep.mubr.f32.mxu0 %v1381_v0 }
 0x380   :  { %1318 = vmatmul.mubr.msk.f32.gmra.mxu0 %vm189_vm2, %v1609_v51 }
 0x381   :  { %619 = vmatprep.mubr.f32.mxu0 %v1381_v0 }
 0x384   :  { %1319 = vmatmul.mubr.msk.f32.gmra.mxu0 %vm189_vm2, %v1614_v56 }
 0x385   :  { %879 = vmatprep.mubr.f32.mxu0 %v1381_v0 }
 0x438   :  { %v603_v57 = vpop.f32.mrf.mxu0 }
 0x439   :  { %v626_v36 = vmax.f32 %v603_v57, 0.0 }
 0x43a   :  { %v605_v58 = vpop.f32.mrf.mxu0 }
 0x43b   :  { %v627_v30 = vmax.f32 %v605_v58, 0.0 }
 0x43c   :  { %v609_v59 = vpop.f32.mrf.mxu0 }
 0x43d   :  { %v628_v15 = vmax.f32 %v609_v59, 0.0 }
 0x43e   :  { %v611_v60 = vpop.f32.mrf.mxu0 }
 0x43f   :  { %v629_v8 = vmax.f32 %v611_v60, 0.0 }
 0x440   :  { %v615_v61 = vpop.f32.mrf.mxu0 }
 0x441   :  { %v630_v6 = vmax.f32 %v615_v61, 0.0  ;;  %v637_v39 = vadd.f32 %v629_v8, %v1562_v18 }
 0x442   :  { %v617_v62 = vpop.f32.mrf.mxu0 }
 0x443   :  { %v631_v3 = vmax.f32 %v617_v62, 0.0  ;;  %v638_v37 = vadd.f32 %v630_v6, %v1558_v16  ;;  %v1633_v16 = vld [vmem:[%s1789_s4] sm:$0x3f] }
 0x444   :  { %v621_v63 = vpop.f32.mrf.mxu0 }
 0x445   :  { %v632_v1 = vmax.f32 %v621_v63, 0.0  ;;  %v639_v31 = vadd.f32 %v631_v3, %v1554_v14  ;;  %v634_v14 = vadd.f32 %v626_v36, %v1574_v23 }
 0x446   :  { %v623_v2 = vpop.f32.mrf.mxu0 }
 0x447   :  { %v633_v4 = vmax.f32 %v623_v2, 0.0  ;;  %v640_v29 = vadd.f32 %v632_v1, %v1551_v12  ;;  %v635_v12 = vadd.f32 %v627_v30, %v1570_v21 }
 0x449   :  { %v641_v13 = vadd.f32 %v633_v4, %v1548_v7  ;;  %v636_v7 = vadd.f32 %v628_v15, %v1566_v19 }
 0x44b   :  { %669 = vmatprep.subr.mxu1 %v641_v13 }
 0x44c   :  { %670 = vmatpush1.msra.mxu1 %v640_v29 }
 0x44d   :  { %671 = vmatprep.subr.mxu1 %v639_v31 }
 0x44e   :  { %672 = vmatpush1.msra.mxu1 %v638_v37 }
 0x44f   :  { %673 = vmatprep.subr.mxu1 %v637_v39 }
 0x450   :  { %674 = vmatpush1.msra.mxu1 %v636_v7 }
 0x451   :  { %675 = vmatprep.subr.mxu1 %v635_v12 }
 0x452   :  { %676 = vmatpush1.msra.mxu1 %v634_v14 }
 0x453   :  { %1320 = vmatmul.mubr.msk.f32.vlgmr.msra.gmra.mxu1 %vm189_vm2, %v1633_v16  ;;  %1322 = vmatprep.subr.msk.mxu1 %vm95_vm0, %v721_v40 }
 0x454   :  { %1323 = vmatpush1.msk.msra.mxu1 %vm95_vm0, %v1321_v38  ;;  %790 = vmatprep.mubr.f32.mxu1 %v1381_v0 }
 0x457   :  { %1324 = vmatmul.mubr.msk.f32.vlgmr.msra.gmra.mxu1 %vm82_vm1, %v1427_v5 }
 0x458   :  { %796 = vmatprep.mubr.f32.mxu1 %v1381_v0 }
 0x45b   :  { %1325 = vmatmul.mubr.msk.f32.gmra.mxu1 %vm82_vm1, %v1446_v9 }
 0x45c   :  { %802 = vmatprep.mubr.f32.mxu1 %v1381_v0 }
 0x45f   :  { %1326 = vmatmul.mubr.msk.f32.gmra.mxu1 %vm82_vm1, %v1454_v10 }
 0x460   :  { %808 = vmatprep.mubr.f32.mxu1 %v1381_v0 }
 0x463   :  { %1327 = vmatmul.mubr.msk.f32.gmra.mxu1 %vm82_vm1, %v1462_v11 }
 0x464   :  { %976 = vmatprep.mubr.f32.mxu1 %v1381_v0 }
 0x513   :  { %v711_v18 = vpop.f32.mrf.mxu1 }
 0x514   :  { %716 = vst [vmem:[%s1790_s5] sm:$0x3f] %v711_v18 }
 0x515   :  { %v713_v5 = vpop.f32.mrf.mxu1 }
 0x516   :  { %717 = vst [vmem:[%s1790_s5 + $0x8] sm:$0x3f] %v713_v5 }
 0x517   :  { %v792_v9 = vpop.f32.mrf.mxu1 }
 0x519   :  { %v794_v19 = vpop.f32.mrf.mxu1 }
 0x51b   :  { %v798_v10 = vpop.f32.mrf.mxu1 }
 0x51c   :  { %v1677_v48 = vadd.f32 %v798_v10, %v1469_v20 }
 0x51d   :  { %v800_v21 = vpop.f32.mrf.mxu1 }
 0x51e   :  { %v1673_v47 = vadd.f32 %v800_v21, %v1469_v20 }
 0x51f   :  { %v804_v23 = vpop.f32.mrf.mxu1 }
 0x520   :  { %v1669_v46 = vadd.f32 %v804_v23, %v1471_v22 }
 0x521   :  { %v806_v41 = vpop.f32.mrf.mxu1 }
 0x522   :  { %v1665_v45 = vadd.f32 %v806_v41, %v1471_v22  ;;  %v1685_v22 = vadd.f32 %v792_v9, %v1487_v27 }
 0x523   :  { %v810_v42 = vpop.f32.mrf.mxu1 }
 0x524   :  { %v1662_v44 = vadd.f32 %v810_v42, %v1467_v17 }
 0x525   :  { %v812_v11 = vpop.f32.mrf.mxu1 }
 0x526   :  { %v1659_v43 = vadd.f32 %v812_v11, %v1467_v17  ;;  %v1681_v17 = vadd.f32 %v794_v19, %v1487_v27 }
 0x528   :  { %839 = vmatprep.subr.mxu0 %v1659_v43 }
 0x529   :  { %840 = vmatpush1.msra.mxu0 %v1662_v44 }
 0x52a   :  { %841 = vmatprep.subr.mxu0 %v1665_v45 }
 0x52b   :  { %842 = vmatpush1.msra.mxu0 %v1669_v46 }
 0x52c   :  { %843 = vmatprep.subr.mxu0 %v1673_v47 }
 0x52d   :  { %844 = vmatpush1.msra.mxu0 %v1677_v48 }
 0x52e   :  { %845 = vmatprep.subr.mxu0 %v1681_v17 }
 0x52f   :  { %846 = vmatpush1.msra.mxu0 %v1685_v22 }
 0x530   :  { %1328 = vmatmul.mubr.msk.f32.vlgmr.msra.gmra.mxu0 %vm189_vm2, %v1505_v32 }
 0x531   :  { %885 = vmatprep.mubr.f32.mxu0 %v1381_v0 }
 0x534   :  { %1329 = vmatmul.mubr.msk.f32.gmra.mxu0 %vm189_vm2, %v1512_v33 }
 0x535   :  { %891 = vmatprep.mubr.f32.mxu0 %v1381_v0 }
 0x538   :  { %1330 = vmatmul.mubr.msk.f32.gmra.mxu0 %vm189_vm2, %v1517_v34 }
 0x539   :  { %897 = vmatprep.mubr.f32.mxu0 %v1381_v0 }
 0x53c   :  { %1331 = vmatmul.mubr.msk.f32.gmra.mxu0 %vm189_vm2, %v1522_v35 }
 0x53d   :  { %1081 = vmatprep.mubr.f32.mxu0 %v1381_v0 }
 0x5f0   :  { %v881_v20 = vpop.f32.mrf.mxu0 }
 0x5f1   :  { %v904_v3 = vmax.f32 %v881_v20, 0.0 }
 0x5f2   :  { %v883_v27 = vpop.f32.mrf.mxu0 }
 0x5f3   :  { %v905_v35 = vmax.f32 %v883_v27, 0.0 }
 0x5f4   :  { %v887_v32 = vpop.f32.mrf.mxu0 }
 0x5f5   :  { %v906_v2 = vmax.f32 %v887_v32, 0.0 }
 0x5f6   :  { %v889_v57 = vpop.f32.mrf.mxu0 }
 0x5f7   :  { %v907_v1 = vmax.f32 %v889_v57, 0.0 }
 0x5f8   :  { %v893_v58 = vpop.f32.mrf.mxu0 }
 0x5f9   :  { %v908_v34 = vmax.f32 %v893_v58, 0.0 }
 0x5fa   :  { %v895_v59 = vpop.f32.mrf.mxu0 }
 0x5fb   :  { %v909_v63 = vmax.f32 %v895_v59, 0.0 }
 0x5fc   :  { %v899_v60 = vpop.f32.mrf.mxu0 }
 0x5fd   :  { %v910_v62 = vmax.f32 %v899_v60, 0.0 }
 0x5fe   :  { %v901_v33 = vpop.f32.mrf.mxu0 }
 0x5ff   :  { %v911_v61 = vmax.f32 %v901_v33, 0.0 }
 0x601   :  { %936 = vmatprep.subr.mxu1 %v911_v61 }
 0x602   :  { %937 = vmatpush1.msra.mxu1 %v910_v62 }
 0x603   :  { %938 = vmatprep.subr.mxu1 %v909_v63 }
 0x604   :  { %939 = vmatpush1.msra.mxu1 %v908_v34 }
 0x605   :  { %940 = vmatprep.subr.mxu1 %v907_v1 }
 0x606   :  { %941 = vmatpush1.msra.mxu1 %v906_v2 }
 0x607   :  { %942 = vmatprep.subr.mxu1 %v905_v35 }
 0x608   :  { %943 = vmatpush1.msra.mxu1 %v904_v3 }
 0x609   :  { %1332 = vmatmul.mubr.msk.f32.vlgmr.msra.gmra.mxu1 %vm189_vm2, %v1527_v52 }
 0x60a   :  { %982 = vmatprep.mubr.f32.mxu1 %v1381_v0 }
 0x60d   :  { %1333 = vmatmul.mubr.msk.f32.gmra.mxu1 %vm189_vm2, %v1532_v53 }
 0x60e   :  { %988 = vmatprep.mubr.f32.mxu1 %v1381_v0 }
 0x611   :  { %1334 = vmatmul.mubr.msk.f32.gmra.mxu1 %vm189_vm2, %v1537_v54 }
 0x612   :  { %994 = vmatprep.mubr.f32.mxu1 %v1381_v0 }
 0x615   :  { %1335 = vmatmul.mubr.msk.f32.gmra.mxu1 %vm189_vm2, %v1542_v55 }
 0x616   :  { %1178 = vmatprep.mubr.f32.mxu1 %v1381_v0 }
 0x6c9   :  { %v978_v4 = vpop.f32.mrf.mxu1 }
 0x6ca   :  { %v1001_v40 = vmax.f32 %v978_v4, 0.0 }
 0x6cb   :  { %v980_v6 = vpop.f32.mrf.mxu1 }
 0x6cc   :  { %v1002_v7 = vmax.f32 %v980_v6, 0.0  ;;  %v1741_v19 = vadd.f32 %v1001_v40, %v1685_v22 }
 0x6cd   :  { %v984_v52 = vpop.f32.mrf.mxu1 }
 0x6ce   :  { %v1003_v39 = vmax.f32 %v984_v52, 0.0  ;;  %v1737_v9 = vadd.f32 %v1002_v7, %v1681_v17 }
 0x6cf   :  { %v986_v8 = vpop.f32.mrf.mxu1 }
 0x6d0   :  { %v1004_v54 = vmax.f32 %v986_v8, 0.0  ;;  %v1733_v5 = vadd.f32 %v1003_v39, %v1677_v48 }
 0x6d1   :  { %v990_v13 = vpop.f32.mrf.mxu1 }
 0x6d2   :  { %v1005_v37 = vmax.f32 %v990_v13, 0.0  ;;  %v1729_v18 = vadd.f32 %v1004_v54, %v1673_v47 }
 0x6d3   :  { %v992_v15 = vpop.f32.mrf.mxu1 }
 0x6d4   :  { %v1006_v31 = vmax.f32 %v992_v15, 0.0  ;;  %v1725_v14 = vadd.f32 %v1005_v37, %v1669_v46 }
 0x6d5   :  { %v996_v29 = vpop.f32.mrf.mxu1 }
 0x6d6   :  { %v1007_v53 = vmax.f32 %v996_v29, 0.0  ;;  %v1721_v12 = vadd.f32 %v1006_v31, %v1665_v45 }
 0x6d7   :  { %v998_v30 = vpop.f32.mrf.mxu1 }
 0x6d8   :  { %v1008_v36 = vmax.f32 %v998_v30, 0.0  ;;  %v1718_v55 = vadd.f32 %v1007_v53, %v1662_v44 }
 0x6da   :  { %v1715_v38 = vadd.f32 %v1008_v36, %v1659_v43 }
 0x6dc   :  { %1041 = vmatprep.subr.mxu0 %v1715_v38 }
 0x6dd   :  { %1042 = vmatpush1.msra.mxu0 %v1718_v55 }
 0x6de   :  { %1043 = vmatprep.subr.mxu0 %v1721_v12 }
 0x6df   :  { %1044 = vmatpush1.msra.mxu0 %v1725_v14 }
 0x6e0   :  { %1045 = vmatprep.subr.mxu0 %v1729_v18 }
 0x6e1   :  { %1046 = vmatpush1.msra.mxu0 %v1733_v5 }
 0x6e2   :  { %1047 = vmatprep.subr.mxu0 %v1737_v9 }
 0x6e3   :  { %1048 = vmatpush1.msra.mxu0 %v1741_v19 }
 0x6e4   :  { %1336 = vmatmul.mubr.msk.f32.vlgmr.msra.gmra.mxu0 %vm189_vm2, %v1577_v24 }
 0x6e5   :  { %1087 = vmatprep.mubr.f32.mxu0 %v1381_v0 }
 0x6e8   :  { %1337 = vmatmul.mubr.msk.f32.gmra.mxu0 %vm189_vm2, %v1584_v25 }
 0x6e9   :  { %1093 = vmatprep.mubr.f32.mxu0 %v1381_v0 }
 0x6ec   :  { %1338 = vmatmul.mubr.msk.f32.gmra.mxu0 %vm189_vm2, %v1589_v26 }
 0x6ed   :  { %1099 = vmatprep.mubr.f32.mxu0 %v1381_v0 }
 0x6f0   :  { %1339 = vmatmul.mubr.msk.f32.gmra.mxu0 %vm189_vm2, %v1594_v28 }
 0x6f1   :  { %1283 = vmatprep.mubr.f32.mxu0 %v1381_v0 }
 0x7a4   :  { %v1083_v10 = vpop.f32.mrf.mxu0 }
 0x7a5   :  { %v1106_v48 = vmax.f32 %v1083_v10, 0.0 }
 0x7a6   :  { %v1085_v21 = vpop.f32.mrf.mxu0 }
 0x7a7   :  { %v1107_v28 = vmax.f32 %v1085_v21, 0.0 }
 0x7a8   :  { %v1089_v24 = vpop.f32.mrf.mxu0 }
 0x7a9   :  { %v1108_v47 = vmax.f32 %v1089_v24, 0.0 }
 0x7aa   :  { %v1091_v23 = vpop.f32.mrf.mxu0 }
 0x7ab   :  { %v1109_v46 = vmax.f32 %v1091_v23, 0.0 }
 0x7ac   :  { %v1095_v41 = vpop.f32.mrf.mxu0 }
 0x7ad   :  { %v1110_v26 = vmax.f32 %v1095_v41, 0.0 }
 0x7ae   :  { %v1097_v42 = vpop.f32.mrf.mxu0 }
 0x7af   :  { %v1111_v45 = vmax.f32 %v1097_v42, 0.0 }
 0x7b0   :  { %v1101_v11 = vpop.f32.mrf.mxu0 }
 0x7b1   :  { %v1112_v44 = vmax.f32 %v1101_v11, 0.0 }
 0x7b2   :  { %v1103_v25 = vpop.f32.mrf.mxu0 }
 0x7b3   :  { %v1113_v43 = vmax.f32 %v1103_v25, 0.0 }
 0x7b5   :  { %1138 = vmatprep.subr.mxu1 %v1113_v43 }
 0x7b6   :  { %1139 = vmatpush1.msra.mxu1 %v1112_v44 }
 0x7b7   :  { %1140 = vmatprep.subr.mxu1 %v1111_v45 }
 0x7b8   :  { %1141 = vmatpush1.msra.mxu1 %v1110_v26 }
 0x7b9   :  { %1142 = vmatprep.subr.mxu1 %v1109_v46 }
 0x7ba   :  { %1143 = vmatpush1.msra.mxu1 %v1108_v47 }
 0x7bb   :  { %1144 = vmatprep.subr.mxu1 %v1107_v28 }
 0x7bc   :  { %1145 = vmatpush1.msra.mxu1 %v1106_v48 }
 0x7bd   :  { %1340 = vmatmul.mubr.msk.f32.vlgmr.msra.gmra.mxu1 %vm189_vm2, %v1599_v49 }
 0x7be   :  { %1184 = vmatprep.mubr.f32.mxu1 %v1381_v0 }
 0x7c1   :  { %1341 = vmatmul.mubr.msk.f32.gmra.mxu1 %vm189_vm2, %v1604_v50 }
 0x7c2   :  { %1190 = vmatprep.mubr.f32.mxu1 %v1381_v0 }
 0x7c5   :  { %1342 = vmatmul.mubr.msk.f32.gmra.mxu1 %vm189_vm2, %v1609_v51 }
 0x7c6   :  { %1196 = vmatprep.mubr.f32.mxu1 %v1381_v0 }
 0x7c9   :  { %1343 = vmatmul.mubr.msk.f32.gmra.mxu1 %vm189_vm2, %v1614_v56 }
 0x87d   :  { %v1180_v17 = vpop.f32.mrf.mxu1 }
 0x87e   :  { %v1203_v34 = vmax.f32 %v1180_v17, 0.0 }
 0x87f   :  { %v1182_v22 = vpop.f32.mrf.mxu1 }
 0x880   :  { %v1204_v63 = vmax.f32 %v1182_v22, 0.0  ;;  %v1211_v4 = vadd.f32 %v1203_v34, %v1741_v19 }
 0x881   :  { %v1186_v20 = vpop.f32.mrf.mxu1 }
 0x882   :  { %v1205_v62 = vmax.f32 %v1186_v20, 0.0  ;;  %v1212_v3 = vadd.f32 %v1204_v63, %v1737_v9 }
 0x883   :  { %v1188_v27 = vpop.f32.mrf.mxu1 }
 0x884   :  { %v1206_v61 = vmax.f32 %v1188_v27, 0.0  ;;  %v1213_v35 = vadd.f32 %v1205_v62, %v1733_v5 }
 0x885   :  { %v1192_v49 = vpop.f32.mrf.mxu1 }
 0x886   :  { %v1207_v33 = vmax.f32 %v1192_v49, 0.0  ;;  %v1214_v2 = vadd.f32 %v1206_v61, %v1729_v18 }
 0x887   :  { %v1194_v32 = vpop.f32.mrf.mxu1 }
 0x888   :  { %v1208_v50 = vmax.f32 %v1194_v32, 0.0  ;;  %v1215_v1 = vadd.f32 %v1207_v33, %v1725_v14 }
 0x889   :  { %v1198_v57 = vpop.f32.mrf.mxu1 }
 0x88a   :  { %v1209_v58 = vmax.f32 %v1198_v57, 0.0  ;;  %v1216_v56 = vadd.f32 %v1208_v50, %v1721_v12 }
 0x88b   :  { %v1200_v59 = vpop.f32.mrf.mxu1 }
 0x88c   :  { %v1210_v60 = vmax.f32 %v1200_v59, 0.0  ;;  %v1217_v0 = vadd.f32 %v1209_v58, %v1718_v55 }
 0x88e   :  { %v1218_v51 = vadd.f32 %v1210_v60, %v1715_v38 }
 0x890   :  { %1243 = vmatprep.subr.mxu0 %v1218_v51 }
 0x891   :  { %1244 = vmatpush1.msra.mxu0 %v1217_v0 }
 0x892   :  { %1245 = vmatprep.subr.mxu0 %v1216_v56 }
 0x893   :  { %1246 = vmatpush1.msra.mxu0 %v1215_v1 }
 0x894   :  { %1247 = vmatprep.subr.mxu0 %v1214_v2 }
 0x895   :  { %1248 = vmatpush1.msra.mxu0 %v1213_v35 }
 0x896   :  { %1249 = vmatprep.subr.mxu0 %v1212_v3 }
 0x897   :  { %1250 = vmatpush1.msra.mxu0 %v1211_v4 }
 0x898   :  { %1344 = vmatmul.mubr.msk.f32.vlgmr.msra.gmra.mxu0 %vm189_vm2, %v1633_v16 }
 0x958   :  { %v1285_v6 = vpop.f32.mrf.mxu0 }
 0x959   :  { %1345 = vst [vmem:[%s1790_s5 + $0x10] sm:$0x3f] %v1285_v6 }
 0x95a   :  { %v1287_v52 = vpop.f32.mrf.mxu0 }
 0x95b   :  { %1346 = vst [vmem:[%s1790_s5 + $0x18] sm:$0x3f] %v1287_v52 }
 0x95c   :  { %1297 = vsyncpa [#allocation3], 1 }

</bundles_post_ra>
